<compile_context>
chip_gen: v7x
topology: tpu7x:2x2x1
jax: 0.10.0
libtpu: 0.0.40
codegen_flags: <defaults>
</compile_context>

<pallas_src>
import math
from functools import partial

import jax
import jax.numpy as jnp
from jax import lax
from jax.experimental import pallas as pl
from jax.experimental.pallas import tpu as pltpu


# ------------------------------- kernel ------------------------------------- #

def _spec_att_kernel(x_ref, ph_ref, pw_ref, bs_ref, wh_ref, ww_ref,
                     eh_ref, ew_ref, o_ref, *, k):
    """One block of Nb images, flattened to (Rb = Nb*C, H*W) lane-dense rows.

    x_ref : (Rb, HW)      activations, row (n, c), lane (hs*W + w)
    ph_ref: (HW, H)       pooling-over-W operator      (constant)
    pw_ref: (HW, W)       pooling-over-H operator      (constant)
    bs_ref: (k, Rb, Rb)   per-tap block-diag channel-shift operators (constant)
    wh_ref: (k, C, H)     conv_h taps, wh[j, i, o] = Wh[o, i, j]     (constant)
    ww_ref: (k, C, W)     conv_w taps                                 (constant)
    eh_ref: (H, HW)       0/1 lane expansion: value at i -> lanes i*W..i*W+W-1
    ew_ref: (W, HW)       0/1 lane expansion: value at w -> lanes w, w+W, ...
    o_ref : (Rb, HW)      attention mask, same flat layout as x
    """
    f32 = jnp.float32
    x = x_ref[...]                                                   # (Rb, HW)

    # AdaptiveAvgPool as matmuls against constant operators (MXU, no XLU reduce).
    ph = jnp.dot(x, ph_ref[...], preferred_element_type=f32)        # (Rb, H)
    pw = jnp.dot(x, pw_ref[...], preferred_element_type=f32)        # (Rb, W)

    # Conv1d along the channel axis (rows within each image's C-row group):
    #   out[(n,c), o] = sum_j sum_i pooled[(n, c + j - pad), i] * W[o, i, j]
    # The zero-padded channel shift is the precomputed block-diagonal bs_ref[j].
    h_acc = jnp.zeros(ph.shape, f32)
    w_acc = jnp.zeros(pw.shape, f32)
    for j in range(k):                       # k is tiny and static -> unrolled
        sh = jnp.dot(bs_ref[j], ph, preferred_element_type=f32)     # (Rb, H)
        sw = jnp.dot(bs_ref[j], pw, preferred_element_type=f32)     # (Rb, W)
        h_acc = h_acc + jnp.dot(sh, wh_ref[j], preferred_element_type=f32)
        w_acc = w_acc + jnp.dot(sw, ww_ref[j], preferred_element_type=f32)

    h_gate = jax.nn.sigmoid(h_acc)                                   # (Rb, H)
    w_gate = jax.nn.sigmoid(w_acc)                                   # (Rb, W)

    # Gating outer product, built along lanes only (no sublane relayout):
    #   mask[(n,c), i*W + w] = h_gate[(n,c), i] * w_gate[(n,c), w]
    h_exp = jnp.dot(h_gate, eh_ref[...], preferred_element_type=f32)  # (Rb, HW)
    w_exp = jnp.dot(w_gate, ew_ref[...], preferred_element_type=f32)  # (Rb, HW)
    o_ref[...] = h_exp * w_exp


# ------------------------------- wrapper ------------------------------------- #

def custom_spec_forward(x, conv_h_w, conv_w_w, *, nb_max=8):
    """x: (N, C, H, W) f32.  conv_h_w / conv_w_w: (C, C, k) torch Conv1d weights."""
    N, C, H, W = x.shape
    k = conv_h_w.shape[-1]
    pad = (k - 1) // 2
    assert H == C and W == C and conv_h_w.shape[1] == C and conv_w_w.shape[1] == C, \
        "CUSTOM_SPEC requires H == W == channels"
    HW = H * W
    f32 = jnp.float32

    # Images per grid step: largest divisor of N that (a) keeps the per-step
    # block small (Rb = Nb*C <= nb_max*C rows) and (b) leaves >= 2 parallel
    # grid steps when N >= 2 so both v7x TensorCores get work.
    limit = min(nb_max, max(1, N // 2)) if N >= 2 else 1
    nb = max(d for d in range(1, limit + 1) if N % d == 0)
    grid_n = N // nb
    Rb = nb * C

    # ---- constant operators (built once, outside the kernel) ----
    hs_idx = jnp.arange(HW) // W                 # lane -> spatial-H index
    w_idx = jnp.arange(HW) % W                   # lane -> spatial-W index
    P_h = (hs_idx[:, None] == jnp.arange(H)[None, :]).astype(f32) / W   # (HW, H)
    P_w = (w_idx[:, None] == jnp.arange(W)[None, :]).astype(f32) / H    # (HW, W)
    E_h = (jnp.arange(H)[:, None] == hs_idx[None, :]).astype(f32)       # (H, HW)
    E_w = (jnp.arange(W)[:, None] == w_idx[None, :]).astype(f32)        # (W, HW)

    # Per-tap zero-padded channel shift S_j (C x C), block-diagonal over the
    # nb images in a block: BS[j] = I_nb (x) S_j, shape (k, Rb, Rb).
    c_idx = jnp.arange(C)
    S = jnp.stack([((c_idx[None, :] - c_idx[:, None]) == (j - pad)).astype(f32)
                   for j in range(k)])                                   # (k, C, C)
    BS = jnp.einsum('ab,kcd->kacbd', jnp.eye(nb, dtype=f32), S).reshape(k, Rb, Rb)

    # torch (Cout, Cin, k) -> (k, Cin, Cout) so the kernel does shifted @ taps[j].
    WhT = jnp.transpose(conv_h_w.astype(f32), (2, 1, 0))                 # (k, C, H)
    WwT = jnp.transpose(conv_w_w.astype(f32), (2, 1, 0))                 # (k, C, W)

    # Lane-dense flat views (free, contiguous reshapes).
    x_flat = x.astype(f32).reshape(N * C, HW)

    out_flat = pl.pallas_call(
        partial(_spec_att_kernel, k=k),
        out_shape=jax.ShapeDtypeStruct((N * C, HW), f32),
        grid=(grid_n,),
        in_specs=[
            pl.BlockSpec((Rb, HW), lambda g: (g, 0)),      # x (streamed)
            pl.BlockSpec((HW, H), lambda g: (0, 0)),       # P_h   (constant)
            pl.BlockSpec((HW, W), lambda g: (0, 0)),       # P_w   (constant)
            pl.BlockSpec((k, Rb, Rb), lambda g: (0, 0, 0)),  # BS  (constant)
            pl.BlockSpec((k, C, H), lambda g: (0, 0, 0)),  # conv_h taps (constant)
            pl.BlockSpec((k, C, W), lambda g: (0, 0, 0)),  # conv_w taps (constant)
            pl.BlockSpec((H, HW), lambda g: (0, 0)),       # E_h   (constant)
            pl.BlockSpec((W, HW), lambda g: (0, 0)),       # E_w   (constant)
        ],
        out_specs=pl.BlockSpec((Rb, HW), lambda g: (g, 0)),
        compiler_params=pltpu.CompilerParams(
            dimension_semantics=("parallel",)),
    )(x_flat, P_h, P_w, BS, WhT, WwT, E_h, E_w)

    return out_flat.reshape(N, C, H, W)


# ---------------------------- pure-JAX reference ----------------------------- #

def ref_forward(x, conv_h_w, conv_w_w):
    N, C, H, W = x.shape
    k = conv_h_w.shape[-1]
    pad = (k - 1) // 2
    dn = ("NCH", "OIH", "NCH")
    prec = lax.Precision.HIGHEST

    ph = jnp.mean(x, axis=3)                       # (N, C, H) pool over W
    h = jnp.swapaxes(ph, 1, 2)                     # (N, H, C)
    h = lax.conv_general_dilated(h, conv_h_w, (1,), [(pad, pad)],
                                 dimension_numbers=dn, precision=prec)
    h = jax.nn.sigmoid(jnp.swapaxes(h, 1, 2))[..., None]         # (N, C, H, 1)

    pw = jnp.mean(x, axis=2)                       # (N, C, W) pool over H
    w = jnp.swapaxes(pw, 1, 2)                     # (N, W, C)
    w = lax.conv_general_dilated(w, conv_w_w, (1,), [(pad, pad)],
                                 dimension_numbers=dn, precision=prec)
    w = jax.nn.sigmoid(jnp.swapaxes(w, 1, 2))[:, :, None, :]     # (N, C, 1, W)
    return h * w


# ---------------------------------- main ------------------------------------- #

if __name__ == "__main__":
    N, C = 2, 16
    H = W = C                        # the module requires spatial dims == channels
    gamma, b = 2, 1
    t = int(abs(math.log(C, 2) + b) / gamma)
    k = t if t % 2 else t + 1        # -> 3 for C = 16

    key = jax.random.PRNGKey(0)
    kx, kh, kw = jax.random.split(key, 3)
    bound = 1.0 / math.sqrt(C * k)   # torch Conv1d default init bound
    x = jax.random.normal(kx, (N, C, H, W), jnp.float32)
    conv_h_w = jax.random.uniform(kh, (C, C, k), jnp.float32, -bound, bound)
    conv_w_w = jax.random.uniform(kw, (C, C, k), jnp.float32, -bound, bound)

    out = jax.block_until_ready(custom_spec_forward(x, conv_h_w, conv_w_w))
    assert out.shape == (N, C, H, W), out.shape

    ref = jax.block_until_ready(ref_forward(x, conv_h_w, conv_w_w))
    max_err = float(jnp.max(jnp.abs(out - ref)))
    # Tight enough to catch any indexing/transposition regression (those show up
    # at O(0.1)); loose enough to tolerate the MXU's default f32 matmul passes.
    assert max_err < 2e-3, f"max abs error {max_err}"

    print("KERNEL_OK")
</pallas_src>

<mosaic_0001>
module attributes {stable_mosaic.version = 11 : i64} {
  func.func @_spec_att_kernel(%arg0: i32, %arg1: memref<16x256xf32, #tpu.memory_space<vmem>>, %arg2: memref<256x16xf32, #tpu.memory_space<vmem>>, %arg3: memref<256x16xf32, #tpu.memory_space<vmem>>, %arg4: memref<3x16x16xf32, #tpu.memory_space<vmem>>, %arg5: memref<3x16x16xf32, #tpu.memory_space<vmem>>, %arg6: memref<3x16x16xf32, #tpu.memory_space<vmem>>, %arg7: memref<16x256xf32, #tpu.memory_space<vmem>>, %arg8: memref<16x256xf32, #tpu.memory_space<vmem>>, %arg9: memref<16x256xf32, #tpu.memory_space<vmem>>) attributes {dimension_semantics = [#tpu.dimension_semantics<parallel>], iteration_bounds = array<i64: 2>, scalar_prefetch = 0 : i64, scratch_operands = 0 : i64, tpu.core_type = #tpu.core_type<tc>, window_params = [{transform_indices = @transform_0, window_bounds = array<i64: 16, 256>}, {pipeline_mode = #tpu.pipeline_mode<synchronous>, transform_indices = @transform_1, window_bounds = array<i64: 256, 16>}, {pipeline_mode = #tpu.pipeline_mode<synchronous>, transform_indices = @transform_2, window_bounds = array<i64: 256, 16>}, {pipeline_mode = #tpu.pipeline_mode<synchronous>, transform_indices = @transform_3, window_bounds = array<i64: 3, 16, 16>}, {pipeline_mode = #tpu.pipeline_mode<synchronous>, transform_indices = @transform_4, window_bounds = array<i64: 3, 16, 16>}, {pipeline_mode = #tpu.pipeline_mode<synchronous>, transform_indices = @transform_5, window_bounds = array<i64: 3, 16, 16>}, {pipeline_mode = #tpu.pipeline_mode<synchronous>, transform_indices = @transform_6, window_bounds = array<i64: 16, 256>}, {pipeline_mode = #tpu.pipeline_mode<synchronous>, transform_indices = @transform_7, window_bounds = array<i64: 16, 256>}, {transform_indices = @transform_8, window_bounds = array<i64: 16, 256>}]} {
    %c0 = arith.constant 0 : index
    %c0_0 = arith.constant 0 : index
    %0 = vector.load %arg1[%c0, %c0_0] : memref<16x256xf32, #tpu.memory_space<vmem>>, vector<16x256xf32>
    %c0_1 = arith.constant 0 : index
    %c0_2 = arith.constant 0 : index
    %1 = vector.load %arg2[%c0_1, %c0_2] : memref<256x16xf32, #tpu.memory_space<vmem>>, vector<256x16xf32>
    %cst = arith.constant dense<0.000000e+00> : vector<16x16xf32>
    %2 = tpu.matmul %0, %1, %cst {dimension_numbers = #tpu.dot_dimension_numbers<[1], [0], [0], [1], [0, 0, 1, 1], [], []>} : vector<16x256xf32>, vector<256x16xf32>, vector<16x16xf32> -> vector<16x16xf32>
    %c0_3 = arith.constant 0 : index
    %c0_4 = arith.constant 0 : index
    %3 = vector.load %arg3[%c0_3, %c0_4] : memref<256x16xf32, #tpu.memory_space<vmem>>, vector<256x16xf32>
    %cst_5 = arith.constant dense<0.000000e+00> : vector<16x16xf32>
    %4 = tpu.matmul %0, %3, %cst_5 {dimension_numbers = #tpu.dot_dimension_numbers<[1], [0], [0], [1], [0, 0, 1, 1], [], []>} : vector<16x256xf32>, vector<256x16xf32>, vector<16x16xf32> -> vector<16x16xf32>
    %cst_6 = arith.constant 0.000000e+00 : f32
    %5 = vector.broadcast %cst_6 : f32 to vector<16x16xf32>
    %cst_7 = arith.constant 0.000000e+00 : f32
    %6 = vector.broadcast %cst_7 : f32 to vector<16x16xf32>
    %c0_8 = arith.constant 0 : index
    %c0_9 = arith.constant 0 : index
    %c0_10 = arith.constant 0 : index
    %7 = vector.load %arg4[%c0_8, %c0_9, %c0_10] : memref<3x16x16xf32, #tpu.memory_space<vmem>>, vector<1x16x16xf32>
    %8 = vector.shape_cast %7 : vector<1x16x16xf32> to vector<16x16xf32>
    %cst_11 = arith.constant dense<0.000000e+00> : vector<16x16xf32>
    %9 = tpu.matmul %8, %2, %cst_11 {dimension_numbers = #tpu.dot_dimension_numbers<[1], [0], [0], [1], [0, 0, 1, 1], [], []>} : vector<16x16xf32>, vector<16x16xf32>, vector<16x16xf32> -> vector<16x16xf32>
    %c0_12 = arith.constant 0 : index
    %c0_13 = arith.constant 0 : index
    %c0_14 = arith.constant 0 : index
    %10 = vector.load %arg4[%c0_12, %c0_13, %c0_14] : memref<3x16x16xf32, #tpu.memory_space<vmem>>, vector<1x16x16xf32>
    %11 = vector.shape_cast %10 : vector<1x16x16xf32> to vector<16x16xf32>
    %cst_15 = arith.constant dense<0.000000e+00> : vector<16x16xf32>
    %12 = tpu.matmul %11, %4, %cst_15 {dimension_numbers = #tpu.dot_dimension_numbers<[1], [0], [0], [1], [0, 0, 1, 1], [], []>} : vector<16x16xf32>, vector<16x16xf32>, vector<16x16xf32> -> vector<16x16xf32>
    %c0_16 = arith.constant 0 : index
    %c0_17 = arith.constant 0 : index
    %c0_18 = arith.constant 0 : index
    %13 = vector.load %arg5[%c0_16, %c0_17, %c0_18] : memref<3x16x16xf32, #tpu.memory_space<vmem>>, vector<1x16x16xf32>
    %14 = vector.shape_cast %13 : vector<1x16x16xf32> to vector<16x16xf32>
    %cst_19 = arith.constant dense<0.000000e+00> : vector<16x16xf32>
    %15 = tpu.matmul %9, %14, %cst_19 {dimension_numbers = #tpu.dot_dimension_numbers<[1], [0], [0], [1], [0, 0, 1, 1], [], []>} : vector<16x16xf32>, vector<16x16xf32>, vector<16x16xf32> -> vector<16x16xf32>
    %16 = arith.addf %5, %15 : vector<16x16xf32>
    %c0_20 = arith.constant 0 : index
    %c0_21 = arith.constant 0 : index
    %c0_22 = arith.constant 0 : index
    %17 = vector.load %arg6[%c0_20, %c0_21, %c0_22] : memref<3x16x16xf32, #tpu.memory_space<vmem>>, vector<1x16x16xf32>
    %18 = vector.shape_cast %17 : vector<1x16x16xf32> to vector<16x16xf32>
    %cst_23 = arith.constant dense<0.000000e+00> : vector<16x16xf32>
    %19 = tpu.matmul %12, %18, %cst_23 {dimension_numbers = #tpu.dot_dimension_numbers<[1], [0], [0], [1], [0, 0, 1, 1], [], []>} : vector<16x16xf32>, vector<16x16xf32>, vector<16x16xf32> -> vector<16x16xf32>
    %20 = arith.addf %6, %19 : vector<16x16xf32>
    %c1 = arith.constant 1 : index
    %c0_24 = arith.constant 0 : index
    %c0_25 = arith.constant 0 : index
    %21 = vector.load %arg4[%c1, %c0_24, %c0_25] : memref<3x16x16xf32, #tpu.memory_space<vmem>>, vector<1x16x16xf32>
    %22 = vector.shape_cast %21 : vector<1x16x16xf32> to vector<16x16xf32>
    %cst_26 = arith.constant dense<0.000000e+00> : vector<16x16xf32>
    %23 = tpu.matmul %22, %2, %cst_26 {dimension_numbers = #tpu.dot_dimension_numbers<[1], [0], [0], [1], [0, 0, 1, 1], [], []>} : vector<16x16xf32>, vector<16x16xf32>, vector<16x16xf32> -> vector<16x16xf32>
    %c1_27 = arith.constant 1 : index
    %c0_28 = arith.constant 0 : index
    %c0_29 = arith.constant 0 : index
    %24 = vector.load %arg4[%c1_27, %c0_28, %c0_29] : memref<3x16x16xf32, #tpu.memory_space<vmem>>, vector<1x16x16xf32>
    %25 = vector.shape_cast %24 : vector<1x16x16xf32> to vector<16x16xf32>
    %cst_30 = arith.constant dense<0.000000e+00> : vector<16x16xf32>
    %26 = tpu.matmul %25, %4, %cst_30 {dimension_numbers = #tpu.dot_dimension_numbers<[1], [0], [0], [1], [0, 0, 1, 1], [], []>} : vector<16x16xf32>, vector<16x16xf32>, vector<16x16xf32> -> vector<16x16xf32>
    %c1_31 = arith.constant 1 : index
    %c0_32 = arith.constant 0 : index
    %c0_33 = arith.constant 0 : index
    %27 = vector.load %arg5[%c1_31, %c0_32, %c0_33] : memref<3x16x16xf32, #tpu.memory_space<vmem>>, vector<1x16x16xf32>
    %28 = vector.shape_cast %27 : vector<1x16x16xf32> to vector<16x16xf32>
    %cst_34 = arith.constant dense<0.000000e+00> : vector<16x16xf32>
    %29 = tpu.matmul %23, %28, %cst_34 {dimension_numbers = #tpu.dot_dimension_numbers<[1], [0], [0], [1], [0, 0, 1, 1], [], []>} : vector<16x16xf32>, vector<16x16xf32>, vector<16x16xf32> -> vector<16x16xf32>
    %30 = arith.addf %16, %29 : vector<16x16xf32>
    %c1_35 = arith.constant 1 : index
    %c0_36 = arith.constant 0 : index
    %c0_37 = arith.constant 0 : index
    %31 = vector.load %arg6[%c1_35, %c0_36, %c0_37] : memref<3x16x16xf32, #tpu.memory_space<vmem>>, vector<1x16x16xf32>
    %32 = vector.shape_cast %31 : vector<1x16x16xf32> to vector<16x16xf32>
    %cst_38 = arith.constant dense<0.000000e+00> : vector<16x16xf32>
    %33 = tpu.matmul %26, %32, %cst_38 {dimension_numbers = #tpu.dot_dimension_numbers<[1], [0], [0], [1], [0, 0, 1, 1], [], []>} : vector<16x16xf32>, vector<16x16xf32>, vector<16x16xf32> -> vector<16x16xf32>
    %34 = arith.addf %20, %33 : vector<16x16xf32>
    %c2 = arith.constant 2 : index
    %c0_39 = arith.constant 0 : index
    %c0_40 = arith.constant 0 : index
    %35 = vector.load %arg4[%c2, %c0_39, %c0_40] : memref<3x16x16xf32, #tpu.memory_space<vmem>>, vector<1x16x16xf32>
    %36 = vector.shape_cast %35 : vector<1x16x16xf32> to vector<16x16xf32>
    %cst_41 = arith.constant dense<0.000000e+00> : vector<16x16xf32>
    %37 = tpu.matmul %36, %2, %cst_41 {dimension_numbers = #tpu.dot_dimension_numbers<[1], [0], [0], [1], [0, 0, 1, 1], [], []>} : vector<16x16xf32>, vector<16x16xf32>, vector<16x16xf32> -> vector<16x16xf32>
    %c2_42 = arith.constant 2 : index
    %c0_43 = arith.constant 0 : index
    %c0_44 = arith.constant 0 : index
    %38 = vector.load %arg4[%c2_42, %c0_43, %c0_44] : memref<3x16x16xf32, #tpu.memory_space<vmem>>, vector<1x16x16xf32>
    %39 = vector.shape_cast %38 : vector<1x16x16xf32> to vector<16x16xf32>
    %cst_45 = arith.constant dense<0.000000e+00> : vector<16x16xf32>
    %40 = tpu.matmul %39, %4, %cst_45 {dimension_numbers = #tpu.dot_dimension_numbers<[1], [0], [0], [1], [0, 0, 1, 1], [], []>} : vector<16x16xf32>, vector<16x16xf32>, vector<16x16xf32> -> vector<16x16xf32>
    %c2_46 = arith.constant 2 : index
    %c0_47 = arith.constant 0 : index
    %c0_48 = arith.constant 0 : index
    %41 = vector.load %arg5[%c2_46, %c0_47, %c0_48] : memref<3x16x16xf32, #tpu.memory_space<vmem>>, vector<1x16x16xf32>
    %42 = vector.shape_cast %41 : vector<1x16x16xf32> to vector<16x16xf32>
    %cst_49 = arith.constant dense<0.000000e+00> : vector<16x16xf32>
    %43 = tpu.matmul %37, %42, %cst_49 {dimension_numbers = #tpu.dot_dimension_numbers<[1], [0], [0], [1], [0, 0, 1, 1], [], []>} : vector<16x16xf32>, vector<16x16xf32>, vector<16x16xf32> -> vector<16x16xf32>
    %44 = arith.addf %30, %43 : vector<16x16xf32>
    %c2_50 = arith.constant 2 : index
    %c0_51 = arith.constant 0 : index
    %c0_52 = arith.constant 0 : index
    %45 = vector.load %arg6[%c2_50, %c0_51, %c0_52] : memref<3x16x16xf32, #tpu.memory_space<vmem>>, vector<1x16x16xf32>
    %46 = vector.shape_cast %45 : vector<1x16x16xf32> to vector<16x16xf32>
    %cst_53 = arith.constant dense<0.000000e+00> : vector<16x16xf32>
    %47 = tpu.matmul %40, %46, %cst_53 {dimension_numbers = #tpu.dot_dimension_numbers<[1], [0], [0], [1], [0, 0, 1, 1], [], []>} : vector<16x16xf32>, vector<16x16xf32>, vector<16x16xf32> -> vector<16x16xf32>
    %48 = arith.addf %34, %47 : vector<16x16xf32>
    %49 = arith.negf %44 : vector<16x16xf32>
    %50 = math.exp %49 : vector<16x16xf32>
    %cst_54 = arith.constant 1.000000e+00 : f32
    %51 = vector.broadcast %cst_54 : f32 to vector<16x16xf32>
    %52 = arith.addf %51, %50 : vector<16x16xf32>
    %53 = arith.divf %51, %52 : vector<16x16xf32>
    %54 = arith.negf %48 : vector<16x16xf32>
    %55 = math.exp %54 : vector<16x16xf32>
    %cst_55 = arith.constant 1.000000e+00 : f32
    %56 = vector.broadcast %cst_55 : f32 to vector<16x16xf32>
    %57 = arith.addf %56, %55 : vector<16x16xf32>
    %58 = arith.divf %56, %57 : vector<16x16xf32>
    %c0_56 = arith.constant 0 : index
    %c0_57 = arith.constant 0 : index
    %59 = vector.load %arg7[%c0_56, %c0_57] : memref<16x256xf32, #tpu.memory_space<vmem>>, vector<16x256xf32>
    %cst_58 = arith.constant dense<0.000000e+00> : vector<16x256xf32>
    %60 = tpu.matmul %53, %59, %cst_58 {dimension_numbers = #tpu.dot_dimension_numbers<[1], [0], [0], [1], [0, 0, 1, 1], [], []>} : vector<16x16xf32>, vector<16x256xf32>, vector<16x256xf32> -> vector<16x256xf32>
    %c0_59 = arith.constant 0 : index
    %c0_60 = arith.constant 0 : index
    %61 = vector.load %arg8[%c0_59, %c0_60] : memref<16x256xf32, #tpu.memory_space<vmem>>, vector<16x256xf32>
    %cst_61 = arith.constant dense<0.000000e+00> : vector<16x256xf32>
    %62 = tpu.matmul %58, %61, %cst_61 {dimension_numbers = #tpu.dot_dimension_numbers<[1], [0], [0], [1], [0, 0, 1, 1], [], []>} : vector<16x16xf32>, vector<16x256xf32>, vector<16x256xf32> -> vector<16x256xf32>
    %63 = arith.mulf %60, %62 : vector<16x256xf32>
    %c0_62 = arith.constant 0 : index
    %c0_63 = arith.constant 0 : index
    %64 = vector.load %arg9[%c0_62, %c0_63] : memref<16x256xf32, #tpu.memory_space<vmem>>, vector<16x256xf32>
    tpu.vector_store %arg9[%c0_62, %c0_63], %63 {strides = array<i32>} : memref<16x256xf32, #tpu.memory_space<vmem>>, vector<16x256xf32>,
    return
  }
  func.func @transform_0(%arg0: i32) -> (i32, i32) {
    %c0_i32 = arith.constant 0 : i32
    %c0_i32_0 = arith.constant 0 : i32
    return %arg0, %c0_i32 : i32, i32
  }
  func.func @transform_1(%arg0: i32) -> (i32, i32) {
    %c0_i32 = arith.constant 0 : i32
    %c0_i32_0 = arith.constant 0 : i32
    %c0_i32_1 = arith.constant 0 : i32
    return %c0_i32, %c0_i32_0 : i32, i32
  }
  func.func @transform_2(%arg0: i32) -> (i32, i32) {
    %c0_i32 = arith.constant 0 : i32
    %c0_i32_0 = arith.constant 0 : i32
    %c0_i32_1 = arith.constant 0 : i32
    return %c0_i32, %c0_i32_0 : i32, i32
  }
  func.func @transform_3(%arg0: i32) -> (i32, i32, i32) {
    %c0_i32 = arith.constant 0 : i32
    %c0_i32_0 = arith.constant 0 : i32
    %c0_i32_1 = arith.constant 0 : i32
    %c0_i32_2 = arith.constant 0 : i32
    return %c0_i32, %c0_i32_0, %c0_i32_1 : i32, i32, i32
  }
  func.func @transform_4(%arg0: i32) -> (i32, i32, i32) {
    %c0_i32 = arith.constant 0 : i32
    %c0_i32_0 = arith.constant 0 : i32
    %c0_i32_1 = arith.constant 0 : i32
    %c0_i32_2 = arith.constant 0 : i32
    return %c0_i32, %c0_i32_0, %c0_i32_1 : i32, i32, i32
  }
  func.func @transform_5(%arg0: i32) -> (i32, i32, i32) {
    %c0_i32 = arith.constant 0 : i32
    %c0_i32_0 = arith.constant 0 : i32
    %c0_i32_1 = arith.constant 0 : i32
    %c0_i32_2 = arith.constant 0 : i32
    return %c0_i32, %c0_i32_0, %c0_i32_1 : i32, i32, i32
  }
  func.func @transform_6(%arg0: i32) -> (i32, i32) {
    %c0_i32 = arith.constant 0 : i32
    %c0_i32_0 = arith.constant 0 : i32
    %c0_i32_1 = arith.constant 0 : i32
    return %c0_i32, %c0_i32_0 : i32, i32
  }
  func.func @transform_7(%arg0: i32) -> (i32, i32) {
    %c0_i32 = arith.constant 0 : i32
    %c0_i32_0 = arith.constant 0 : i32
    %c0_i32_1 = arith.constant 0 : i32
    return %c0_i32, %c0_i32_0 : i32, i32
  }
  func.func @transform_8(%arg0: i32) -> (i32, i32) {
    %c0_i32 = arith.constant 0 : i32
    %c0_i32_0 = arith.constant 0 : i32
    return %arg0, %c0_i32 : i32, i32
  }
}

</mosaic_0001>

<bundles_post_ra>
// kernel: tpu_custom_call.1
= control target key start
LH: loop header
LB: loop body
LE: loop exit
PB: predicated region body
PF: predicated region fallthrough
CT: control target
= control target key end

     0   :  { %13 = vsyncpa [#allocation3], 0  ;;  %s2797_s0 = inlined_call_operand.vmem [shape: f32[32,256], index: 0, kind: input, shape index: {}]   ;;  %s2798_s1 = inlined_call_operand.vmem [shape: f32[256,16], index: 1, kind: input, shape index: {}]   ;;  %s2799_s2 = inlined_call_operand.vmem [shape: f32[256,16], index: 2, kind: input, shape index: {}]   ;;  %s2800_s3 = inlined_call_operand.vmem [shape: f32[3,16,16], index: 3, kind: input, shape index: {}]   ;;  %s2801_s4 = inlined_call_operand.vmem [shape: f32[3,16,16], index: 4, kind: input, shape index: {}]   ;;  %s2802_s5 = inlined_call_operand.vmem [shape: f32[3,16,16], index: 5, kind: input, shape index: {}]   ;;  %s2803_s6 = inlined_call_operand.vmem [shape: f32[16,256], index: 6, kind: input, shape index: {}]   ;;  %s2804_s7 = inlined_call_operand.vmem [shape: f32[16,256], index: 7, kind: input, shape index: {}]   ;;  %s2805_s8 = inlined_call_operand.hbm [shape: f32[32,256], index: 8, kind: output, shape index: {}]  }
   0x1   :  { %15 = vsyncpa [#allocation3 + $0x1], 0  ;;  %s2362_s27 = smov 0   ;;  %s2364_s28 = smov 0  }
   0x2   :  { %s2366_s29 = smov 0   ;;  %s2368_s30 = smov 0  }
   0x3 LB: > { %s2383_s9 = sadd.s32 4294967295, %s2311_s30   ;;  %s1794_s10 = sadd.s32 4294967294, %s2311_s30   ;;  %s2311_s30 = sphi %s2368_s30, %s2814_s30   ;;  %s2307_s29 = sphi %s2366_s29, %s2813_s29   ;;  %s2303_s28 = sphi %s2364_s28, %s2812_s28   ;;  %s2299_s27 = sphi %s2362_s27, %s2811_s27  }
   0x4   : > { %s2387_s11 = sadd.s32 1, %s2311_s30   ;;  %s201_s12 = sadd.s32 1, %s2307_s29 }
   0x5   : > { %s198_s13 = ssub.s32 %s2311_s30, %s2387_s11  ;;  %p211_p0 = scmp.ne.s32.totalorder %s2307_s29, %s2303_s28 }
   0x6   : > { %p199_p1 = scmp.eq.s32.totalorder %s198_s13, 0  ;;  %p212_p2 = scmp.eq.s32.totalorder %s2383_s9, 1 }
   0x7   : > { %p217_p3 = scmp.ne.s32.totalorder %s2303_s28, %s2299_s27  ;;  %p218_p4 = scmp.eq.s32.totalorder %s1794_s10, 1 }
   0x8   : > { %s2398_s14 = scalar_select %p199_p1, %s2307_s29, %s201_s12  }
   0x9   : > { %p2400_p5 = por %p212_p2, %p211_p0  ;;  %p2404_p6 = por %p218_p4, %p217_p3 }
   0xa   : > { %p1797_p7 = scmp.ge.s32.totalorder %s2311_s30, 1  ;;  %p267_p8 = scmp.lt.s32.totalorder %s2311_s30, 3 }
   0xc   : > { %p268_p9 = pnand %p1797_p7, %p267_p8 }
   0xd   : > { %v330_v0 = vld [vmem:[%s2798_s1 + $0x80] sm:$0xff] (!%p268_p9)  ;;  %v331_v1 = vld [vmem:[%s2798_s1 + $0x88] sm:$0xff] (!%p268_p9)  ;;  %v332_v11 = vld [vmem:[%s2798_s1 + $0x90] sm:$0xff] (!%p268_p9)  ;;  %s2806_s21 = sshll.u32 (!%p268_p9), %s2383_s9, 1  ;;  %s2810_s17 = sshll.u32 (!%p268_p9), %s2383_s9, 1  ;;  %vm530_vm0 = vcmask (!%p268_p9), 130048  }
   0xe   : > { %271 = sbr.rel (%p268_p9) target bundleno = 1193 (0x4a9), region = 52  ;;  %v437_v2 = vld [vmem:[%s2799_s2 + $0x80] sm:$0xff] (!%p268_p9)  ;;  %v2063_v3 = vpack.c.bf16 (!%p268_p9), %v331_v1, %v330_v0  ;;  %v438_v4 = vld [vmem:[%s2799_s2 + $0x88] sm:$0xff] (!%p268_p9)  ;;  %v333_v13 = vld [vmem:[%s2798_s1 + $0x98] sm:$0xff] (!%p268_p9)  ;;  %p2485_p10 = scmp.lt.s32.totalorder (!%p268_p9), %s2806_s21, 3 }
   0xf   : > { %v314_v5 = vld [vmem:[%s2798_s1] sm:$0xff] (!%p268_p9)  ;;  %v315_v6 = vld [vmem:[%s2798_s1 + $0x8] sm:$0xff] (!%p268_p9)  ;;  %v2095_v7 = vpack.c.bf16 (!%p268_p9), %v438_v4, %v437_v2  ;;  %v439_v14 = vld [vmem:[%s2799_s2 + $0x90] sm:$0xff] (!%p268_p9)  ;;  %v2067_v16 = vpack.c.bf16 (!%p268_p9), %v333_v13, %v332_v11  ;;  %s299_s13 = sand.u32 (!%p268_p9), 1, %s2303_s28   ;;  %s1854_s19 = sshll.u32 (!%p268_p9), %s2383_s9, 9 }
  0x10   : > { %v2065_v8 = vpack.c.bf16 (!%p268_p9), %v315_v6, %v314_v5  ;;  %v421_v9 = vld [vmem:[%s2799_s2] sm:$0xff] (!%p268_p9)  ;;  %v422_v10 = vld [vmem:[%s2799_s2 + $0x8] sm:$0xff] (!%p268_p9)  ;;  %2064 = vmatprep.subr.bf16.mxu0 (!%p268_p9), %v2063_v3  ;;  %v440_v15 = vld [vmem:[%s2799_s2 + $0x98] sm:$0xff] (!%p268_p9)  ;;  %s1798_s18 = sshll.u32 (!%p268_p9), %s299_s13, 5  ;;  %s2754_s23 = scalar_lea.hbm (!%p268_p9), %s2805_s8, %s1854_s19 }
  0x11   : > { %v2097_v12 = vpack.c.bf16 (!%p268_p9), %v422_v10, %v421_v9  ;;  %2096 = vmatprep.subr.bf16.mxu1 (!%p268_p9), %v2095_v7  ;;  %v2099_v17 = vpack.c.bf16 (!%p268_p9), %v440_v15, %v439_v14  ;;  %v316_v18 = vld [vmem:[%s2798_s1 + $0x10] sm:$0xff] (!%p268_p9)  ;;  %v317_v19 = vld [vmem:[%s2798_s1 + $0x18] sm:$0xff] (!%p268_p9)  ;;  %v334_v23 = vld [vmem:[%s2798_s1 + $0xa0] sm:$0xff] (!%p268_p9)  ;;  %s2756_s12 = scalar_lea.sflag (!%p268_p9), [#allocation3], %s299_s13  ;;  %s2314_s25 = smov (!%p268_p9), [#allocation2]  }
  0x12   : > { %2066 = vmatpush3.bf16.msra.mxu0 (!%p268_p9), %v2065_v8  ;;  %v423_v20 = vld [vmem:[%s2799_s2 + $0x10] sm:$0xff] (!%p268_p9)  ;;  %v2069_v21 = vpack.c.bf16 (!%p268_p9), %v317_v19, %v316_v18  ;;  %v424_v22 = vld [vmem:[%s2799_s2 + $0x18] sm:$0xff] (!%p268_p9)  ;;  %v335_v24 = vld [vmem:[%s2798_s1 + $0xa8] sm:$0xff] (!%p268_p9)  ;;  %s2253_s26 = sshll.u32 (!%p268_p9), %s2314_s25, 4  ;;  %s2254_s26 = int_to_ptr.vmem [resolvable:$false] %s2253_s26 }
  0x13   : > { %2098 = vmatpush3.bf16.msra.mxu1 (!%p268_p9), %v2097_v12  ;;  %2068 = vmatprep.subr.bf16.mxu0 (!%p268_p9), %v2067_v16  ;;  %v2101_v25 = vpack.c.bf16 (!%p268_p9), %v424_v22, %v423_v20  ;;  %v2071_v26 = vpack.c.bf16 (!%p268_p9), %v335_v24, %v334_v23  ;;  %v441_v27 = vld [vmem:[%s2799_s2 + $0xa0] sm:$0xff] (!%p268_p9)  ;;  %v442_v28 = vld [vmem:[%s2799_s2 + $0xa8] sm:$0xff] (!%p268_p9)  ;;  %v336_v35 = vld [vmem:[%s2798_s1 + $0xb0] sm:$0xff] (!%p268_p9)  ;;  %s2255_s10 = scalar_lea.vmem (!%p268_p9), %s2254_s26, 1024 }
  0x14   : > { %2100 = vmatprep.subr.bf16.mxu1 (!%p268_p9), %v2099_v17  ;;  %v318_v29 = vld [vmem:[%s2798_s1 + $0x20] sm:$0xff] (!%p268_p9)  ;;  %v2103_v30 = vpack.c.bf16 (!%p268_p9), %v442_v28, %v441_v27  ;;  %v319_v31 = vld [vmem:[%s2798_s1 + $0x28] sm:$0xff] (!%p268_p9)  ;;  %v337_v36 = vld [vmem:[%s2798_s1 + $0xb8] sm:$0xff] (!%p268_p9) }
  0x15   : > { %v425_v32 = vld [vmem:[%s2799_s2 + $0x20] sm:$0xff]  ;;  %v426_v33 = vld [vmem:[%s2799_s2 + $0x28] sm:$0xff]  ;;  %v2073_v34 = vpack.c.bf16 %v319_v31, %v318_v29  ;;  %v443_v37 = vld [vmem:[%s2799_s2 + $0xb0] sm:$0xff]  ;;  %v2075_v39 = vpack.c.bf16 %v337_v36, %v336_v35  ;;  %s2816_s17 = smov (!%p2485_p10, %s2810_s17), 3 }
  0x16   : > { %2070 = vmatpush3.bf16.msra.mxu0 %v2069_v21  ;;  %v2105_v38 = vpack.c.bf16 %v426_v33, %v425_v32  ;;  %v444_v40 = vld [vmem:[%s2799_s2 + $0xb8] sm:$0xff]  ;;  %v320_v41 = vld [vmem:[%s2798_s1 + $0x30] sm:$0xff]  ;;  %v338_v46 = vld [vmem:[%s2798_s1 + $0xc0] sm:$0xff]  ;;  %s1852_s21 = sshll.u32 %s2816_s17, 4 }
  0x17   : > { %2102 = vmatpush3.bf16.msra.mxu1 %v2101_v25  ;;  %2072 = vmatprep.subr.bf16.mxu0 %v2071_v26  ;;  %v321_v42 = vld [vmem:[%s2798_s1 + $0x38] sm:$0xff]  ;;  %v2107_v43 = vpack.c.bf16 %v444_v40, %v443_v37  ;;  %v427_v44 = vld [vmem:[%s2799_s2 + $0x30] sm:$0xff]  ;;  %v339_v47 = vld [vmem:[%s2798_s1 + $0xc8] sm:$0xff]  ;;  %s2577_s24 = scalar_lea.vmem %s2797_s0, %s1852_s21 }
  0x18   : > { %2104 = vmatprep.subr.bf16.mxu1 %v2103_v30  ;;  %v428_v45 = vld [vmem:[%s2799_s2 + $0x38] sm:$0xff]  ;;  %v445_v48 = vld [vmem:[%s2799_s2 + $0xc0] sm:$0xff]  ;;  %v446_v49 = vld [vmem:[%s2799_s2 + $0xc8] sm:$0xff]  ;;  %v2077_v50 = vpack.c.bf16 %v321_v42, %v320_v41  ;;  %v2079_v52 = vpack.c.bf16 %v339_v47, %v338_v46 }
  0x19   : > { %v2109_v51 = vpack.c.bf16 %v428_v45, %v427_v44  ;;  %v322_v53 = vld [vmem:[%s2798_s1 + $0x40] sm:$0xff]  ;;  %v323_v54 = vld [vmem:[%s2798_s1 + $0x48] sm:$0xff]  ;;  %v2111_v56 = vpack.c.bf16 %v446_v49, %v445_v48  ;;  %v340_v58 = vld [vmem:[%s2798_s1 + $0xd0] sm:$0xff] }
  0x1a   : > { %2074 = vmatpush3.bf16.msra.mxu0 %v2073_v34  ;;  %v429_v55 = vld [vmem:[%s2799_s2 + $0x40] sm:$0xff]  ;;  %v430_v57 = vld [vmem:[%s2799_s2 + $0x48] sm:$0xff]  ;;  %v341_v59 = vld [vmem:[%s2798_s1 + $0xd8] sm:$0xff]  ;;  %v2081_v62 = vpack.c.bf16 %v323_v54, %v322_v53 }
  0x1b   : > { %2106 = vmatpush3.bf16.msra.mxu1 %v2105_v38  ;;  %2076 = vmatprep.subr.bf16.mxu0 %v2075_v39  ;;  %v447_v60 = vld [vmem:[%s2799_s2 + $0xd0] sm:$0xff]  ;;  %v448_v61 = vld [vmem:[%s2799_s2 + $0xd8] sm:$0xff]  ;;  %v2113_v63 = vpack.c.bf16 %v430_v57, %v429_v55  ;;  %v2083_v0 = vpack.c.bf16 %v341_v59, %v340_v58  ;;  %v342_v6 = vld [vmem:[%s2798_s1 + $0xe0] sm:$0xff] }
  0x1c   : > { %2108 = vmatprep.subr.bf16.mxu1 %v2107_v43  ;;  %v324_v1 = vld [vmem:[%s2798_s1 + $0x50] sm:$0xff]  ;;  %v325_v2 = vld [vmem:[%s2798_s1 + $0x58] sm:$0xff]  ;;  %v2115_v4 = vpack.c.bf16 %v448_v61, %v447_v60  ;;  %v343_v7 = vld [vmem:[%s2798_s1 + $0xe8] sm:$0xff] }
  0x1d   : > { %v431_v3 = vld [vmem:[%s2799_s2 + $0x50] sm:$0xff]  ;;  %v432_v5 = vld [vmem:[%s2799_s2 + $0x58] sm:$0xff]  ;;  %v449_v8 = vld [vmem:[%s2799_s2 + $0xe0] sm:$0xff]  ;;  %v2085_v10 = vpack.c.bf16 %v325_v2, %v324_v1  ;;  %v2087_v13 = vpack.c.bf16 %v343_v7, %v342_v6 }
  0x1e   : > { %2078 = vmatpush3.bf16.msra.mxu0 %v2077_v50  ;;  %v450_v9 = vld [vmem:[%s2799_s2 + $0xe8] sm:$0xff]  ;;  %v326_v11 = vld [vmem:[%s2798_s1 + $0x60] sm:$0xff]  ;;  %v2117_v12 = vpack.c.bf16 %v432_v5, %v431_v3  ;;  %v344_v19 = vld [vmem:[%s2798_s1 + $0xf0] sm:$0xff] }
  0x1f   : > { %2110 = vmatpush3.bf16.msra.mxu1 %v2109_v51  ;;  %2080 = vmatprep.subr.bf16.mxu0 %v2079_v52  ;;  %v327_v14 = vld [vmem:[%s2798_s1 + $0x68] sm:$0xff]  ;;  %v433_v15 = vld [vmem:[%s2799_s2 + $0x60] sm:$0xff]  ;;  %v2119_v17 = vpack.c.bf16 %v450_v9, %v449_v8  ;;  %v345_v20 = vld [vmem:[%s2798_s1 + $0xf8] sm:$0xff] }
  0x20   : > { %2112 = vmatprep.subr.bf16.mxu1 %v2111_v56  ;;  %v311_v16 = vld [vmem:[%s2577_s24 + $0x8] sm:$0xff]  ;;  %v451_v21 = vld [vmem:[%s2799_s2 + $0xf0] sm:$0xff]  ;;  %v452_v22 = vld [vmem:[%s2799_s2 + $0xf8] sm:$0xff]  ;;  %v2089_v23 = vpack.c.bf16 %v327_v14, %v326_v11  ;;  %v2091_v25 = vpack.c.bf16 %v345_v20, %v344_v19 }
  0x21   : > { %v434_v18 = vld [vmem:[%s2799_s2 + $0x68] sm:$0xff]  ;;  %410 = vmatprep.mubr.f32.mxu0 %v311_v16  ;;  %517 = vmatprep.mubr.f32.mxu1 %v311_v16  ;;  %v328_v26 = vld [vmem:[%s2798_s1 + $0x70] sm:$0xff]  ;;  %v329_v27 = vld [vmem:[%s2798_s1 + $0x78] sm:$0xff]  ;;  %v2123_v28 = vpack.c.bf16 %v452_v22, %v451_v21 }
  0x22   : > { %2082 = vmatpush3.bf16.msra.mxu0 %v2081_v62  ;;  %v2121_v24 = vpack.c.bf16 %v434_v18, %v433_v15  ;;  %v435_v29 = vld [vmem:[%s2799_s2 + $0x70] sm:$0xff]  ;;  %v436_v30 = vld [vmem:[%s2799_s2 + $0x78] sm:$0xff]  ;;  %v2093_v31 = vpack.c.bf16 %v329_v27, %v328_v26  ;;  %v310_v33 = vld [vmem:[%s2577_s24] sm:$0xff] }
  0x23   : > { %2114 = vmatpush3.bf16.msra.mxu1 %v2113_v63  ;;  %2084 = vmatprep.subr.bf16.mxu0 %v2083_v0  ;;  %v2125_v32 = vpack.c.bf16 %v436_v30, %v435_v29  ;;  %v313_v34 = vld [vmem:[%s2577_s24 + $0x18] sm:$0xff]  ;;  %v312_v35 = vld [vmem:[%s2577_s24 + $0x10] sm:$0xff]  ;;  %v528_v36 = vld [vmem:[%s2800_s3] sm:$0xff]  ;;  %v2313_v29 = vmov 0.0   ;;  %s301_s24 = scalar_lea.vmem [#allocation2], %s1798_s18 }
  0x24   : > { %2116 = vmatprep.subr.bf16.mxu1 %v2115_v4  ;;  %v529_v51 = vld [vmem:[%s2800_s3 + $0x8] sm:$0xff]  ;;  %v1806_v52 = vld [vmem:[%s2800_s3 + $0x10] sm:$0xff]  ;;  %v1807_v53 = vld [vmem:[%s2800_s3 + $0x18] sm:$0xff]  ;;  %s1732_s21 = sshll.u32 %s301_s24, 4  ;;  %s2749_s21 = int_to_ptr.vmem [resolvable:$true] %s1732_s21 }
  0x25   : > { %v1812_v54 = vld [vmem:[%s2801_s4 + $0x10] sm:$0xff]  ;;  %v1813_v55 = vld [vmem:[%s2801_s4 + $0x18] sm:$0xff]  ;;  %v687_v60 = vld [vmem:[%s2801_s4] sm:$0xff]  ;;  %s2249_s9 = scalar_lea.vmem %s2749_s21, 512  ;;  %p2256_p0 = scmp.lt.s32.totalorder %s2749_s21, %s2254_s26 }
  0x26   : > { %2086 = vmatpush3.bf16.msra.mxu0 %v2085_v10  ;;  %v1818_v56 = vld [vmem:[%s2802_s5 + $0x10] sm:$0xff]  ;;  %v2143_v57 = vpack.c.bf16 %v1813_v55, %v1812_v54  ;;  %v1819_v58 = vld [vmem:[%s2802_s5 + $0x18] sm:$0xff]  ;;  %v688_v61 = vld [vmem:[%s2801_s4 + $0x8] sm:$0xff]  ;;  %p2250_p11 = scmp.ne.s32.totalorder %s2749_s21, %s2249_s9  ;;  %p2257_p1 = scmp.lt.s32.totalorder %s2255_s10, %s2249_s9 }
  0x27   : > { %2118 = vmatpush3.bf16.msra.mxu1 %v2117_v12  ;;  %2088 = vmatprep.subr.bf16.mxu0 %v2087_v13  ;;  %v2151_v59 = vpack.c.bf16 %v1819_v58, %v1818_v56  ;;  %v689_v62 = vld [vmem:[%s2802_s5] sm:$0xff]  ;;  %v2147_v63 = vpack.c.bf16 %v688_v61, %v687_v60  ;;  %v690_v0 = vld [vmem:[%s2802_s5 + $0x8] sm:$0xff]  ;;  %v1625_v26 = vld [vmem:[%s2804_s7 + $0x18] sm:$0xff] }
  0x28   : > { %2120 = vmatprep.subr.bf16.mxu1 %v2119_v17  ;;  %v2155_v1 = vpack.c.bf16 %v690_v0, %v689_v62  ;;  %v1830_v10 = vld [vmem:[%s2801_s4 + $0x20] sm:$0xff]  ;;  %v1831_v11 = vld [vmem:[%s2801_s4 + $0x28] sm:$0xff]  ;;  %p2251_p12 = pnand %p2250_p11, %p2400_p5  ;;  %p2258_p2 = por %p2257_p1, %p2256_p0 }
  0x29   : > { %v1834_v12 = vld [vmem:[%s2802_s5 + $0x20] sm:$0xff]  ;;  %v1835_v13 = vld [vmem:[%s2802_s5 + $0x28] sm:$0xff]  ;;  %v2167_v15 = vpack.c.bf16 %v1831_v11, %v1830_v10 }
  0x2a   : > { %2090 = vmatpush3.bf16.msra.mxu0 %v2089_v23  ;;  %v1824_v14 = vld [vmem:[%s2800_s3 + $0x20] sm:$0xff]  ;;  %v2171_v16 = vpack.c.bf16 %v1835_v13, %v1834_v12  ;;  %v1825_v17 = vld [vmem:[%s2800_s3 + $0x28] sm:$0xff]  ;;  %v1538_v23 = vld [vmem:[%s2803_s6 + $0x18] sm:$0xff]  ;;  %p2252_p13 = pneg %p2251_p12 }
  0x2b   : > { %2122 = vmatpush3.bf16.msra.mxu1 %v2121_v24  ;;  %2092 = vmatprep.subr.bf16.mxu0 %v2091_v25  ;;  %v1536_v22 = vld [vmem:[%s2803_s6 + $0x8] sm:$0xff]  ;;  %v1535_v27 = vld [vmem:[%s2803_s6] sm:$0xff] }
  0x2c   : > { %2124 = vmatprep.subr.bf16.mxu1 %v2123_v28  ;;  %v1623_v24 = vld [vmem:[%s2804_s7 + $0x8] sm:$0xff]  ;;  %v2175_v25 = vpack.c.bf16 %v1538_v23, %v1536_v22  ;;  %v1537_v28 = vld [vmem:[%s2803_s6 + $0x10] sm:$0xff]  ;;  %p2259_p3 = pnand %p2258_p2, %p2252_p13 }
  0x2d   : > { %v2179_v30 = vpack.c.bf16 %v1625_v26, %v1623_v24 }
  0x2e   : > { %2094 = vmatpush3.bf16.msra.mxu0 %v2093_v31  ;;  %v2177_v31 = vpack.c.bf16 %v1537_v28, %v1535_v27 }
  0x2f   : > { %2126 = vmatpush3.bf16.msra.mxu1 %v2125_v32  ;;  %v1622_v32 = vld [vmem:[%s2804_s7] sm:$0xff] }
  0x31   : > { %411 = vmatmul.mubr.f32.vlgmr.msra.gmra.mrb[0].mxu0 %v310_v33 }
  0x32   : > { %518 = vmatmul.mubr.f32.vlgmr.msra.gmra.mrb[0].mxu1 %v310_v33  ;;  %415 = vmatprep.mubr.f32.mxu0 %v313_v34  ;;  %v1624_v33 = vld [vmem:[%s2804_s7 + $0x10] sm:$0xff] }
  0x33   : > { %522 = vmatprep.mubr.f32.mxu1 %v313_v34  ;;  %v2181_v34 = vpack.c.bf16 %v1624_v33, %v1622_v32 }
  0x35   : > { %416 = vmatmul.mubr.f32.gmra.mrb[2].mxu0 %v312_v35 }
  0x36   : > { %523 = vmatmul.mubr.f32.gmra.mrb[2].mxu1 %v312_v35  ;;  %1983 = vmatprep.mubr.msk.f32.mxu0 %vm530_vm0, %v528_v36 }
  0x37   : > { %1990 = vmatprep.mubr.msk.f32.mxu1 %vm530_vm0, %v528_v36 }
 0x104   : > { %v1887_v37 = vpop.f32.mrb[0].mxu0 }
 0x105   : > { %v1925_v38 = vpop.f32.mrb[0].mxu1  ;;  %v1888_v39 = vpop.f32.mrb[1].mxu0 }
 0x106   : > { %v1889_v40 = vadd.f32 %v1888_v39, %v1887_v37  ;;  %v1926_v41 = vpop.f32.mrb[1].mxu1 }
 0x107   : > { %v1927_v42 = vadd.f32 %v1926_v41, %v1925_v38 }
 0x108   : > { %v1890_v43 = vpop.f32.mrb[2].mxu0 }
 0x109   : > { %v1928_v44 = vpop.f32.mrb[2].mxu1  ;;  %v1891_v45 = vpop.f32.mrb[3].mxu0 }
 0x10a   : > { %v1892_v46 = vadd.f32 %v1891_v45, %v1890_v43  ;;  %v1929_v47 = vpop.f32.mrb[3].mxu1 }
 0x10b   : > { %v1930_v48 = vadd.f32 %v1929_v47, %v1928_v44 }
 0x10c   : > { %v2630_v49 = vpack.c.bf16 %v1892_v46, %v1889_v40 }
 0x10d   : > { %v2632_v50 = vpack.c.bf16 %v1930_v48, %v1927_v42 }
 0x10e   : > { %2128 = vmatprep.subr.bf16.mxu0 %v2630_v49 }
 0x10f   : > { %2132 = vmatprep.subr.bf16.mxu1 %v2632_v50  ;;  %2130 = vmatpush3.bf16.msra.mxu0 %v2630_v49 }
 0x110   : > { %2134 = vmatpush3.bf16.msra.mxu1 %v2632_v50  ;;  %2136 = vmatprep.subr.bf16.mxu0 %v2630_v49 }
 0x111   : > { %2140 = vmatprep.subr.bf16.mxu1 %v2632_v50 }
 0x112   : > { %1984 = vmatmul.mubr.msk.f32.vlgmr.msra.gmra.mrb[4].mxu0 %vm530_vm0, %v529_v51 }
 0x113   : > { %1991 = vmatmul.mubr.msk.f32.vlgmr.msra.gmra.mrb[4].mxu1 %vm530_vm0, %v529_v51  ;;  %2138 = vmatpush3.bf16.msra.mxu0 %v2630_v49 }
 0x114   : > { %2142 = vmatpush3.bf16.msra.mxu1 %v2632_v50  ;;  %1997 = vmatprep.mubr.msk.f32.mxu0 %vm530_vm0, %v1806_v52 }
 0x115   : > { %2004 = vmatprep.mubr.msk.f32.mxu1 %vm530_vm0, %v1806_v52  ;;  %2144 = vmatprep.subr.bf16.mxu0 %v2143_v57 }
 0x116   : > { %1998 = vmatmul.mubr.msk.f32.vlgmr.msra.gmra.mrb[6].mxu0 %vm530_vm0, %v1807_v53  ;;  %2152 = vmatprep.subr.bf16.mxu1 %v2151_v59 }
 0x117   : > { %2005 = vmatmul.mubr.msk.f32.vlgmr.msra.gmra.mrb[6].mxu1 %vm530_vm0, %v1807_v53  ;;  %2146 = vmatpush3.bf16.msra.mxu0 %v2143_v57 }
 0x118   : > { %2154 = vmatpush3.bf16.msra.mxu1 %v2151_v59  ;;  %2148 = vmatprep.subr.bf16.mxu0 %v2147_v63 }
 0x119   : > { %2156 = vmatprep.subr.bf16.mxu1 %v2155_v1 }
 0x1e5   : > { %v1985_v2 = vpop.f32.mrb[4].mxu0 }
 0x1e6   : > { %v1992_v3 = vpop.f32.mrb[4].mxu1  ;;  %v603_v4 = vpop.f32.mrb[5].mxu0 }
 0x1e7   : > { %v678_v5 = vpop.f32.mrb[5].mxu1 }
 0x1e9   : > { %v1999_v6 = vpop.f32.mrb[6].mxu0 }
 0x1ea   : > { %v2006_v7 = vpop.f32.mrb[6].mxu1  ;;  %v766_v8 = vpop.f32.mrb[7].mxu0 }
 0x1eb   : > { %v841_v9 = vpop.f32.mrb[7].mxu1  ;;  %2011 = vmatprep.mubr.msk.f32.mxu0 %vm530_vm0, %v766_v8 }
 0x1ec   : > { %2025 = vmatprep.mubr.msk.f32.mxu1 %vm530_vm0, %v841_v9  ;;  %2012 = vmatmul.mubr.msk.f32.vlgmr.msra.gmra.mrb[8].mxu0 %vm530_vm0, %v1999_v6 }
 0x1ed   : > { %2150 = vmatpush3.bf16.msra.mxu0 %v2147_v63  ;;  %2026 = vmatmul.mubr.msk.f32.vlgmr.msra.gmra.mrb[8].mxu1 %vm530_vm0, %v2006_v7 }
 0x1ee   : > { %2158 = vmatpush3.bf16.msra.mxu1 %v2155_v1  ;;  %2018 = vmatprep.mubr.msk.f32.mxu0 %vm530_vm0, %v603_v4 }
 0x1ef   : > { %2032 = vmatprep.mubr.msk.f32.mxu1 %vm530_vm0, %v678_v5  ;;  %2160 = vmatprep.subr.bf16.mxu0 %v2630_v49 }
 0x1f0   : > { %2164 = vmatprep.subr.bf16.mxu1 %v2632_v50 }
 0x1f4   : > { %2019 = vmatmul.mubr.msk.f32.vlgmr.msra.gmra.mrb[8].mxu0 %vm530_vm0, %v1985_v2 }
 0x1f5   : > { %2033 = vmatmul.mubr.msk.f32.vlgmr.msra.gmra.mrb[8].mxu1 %vm530_vm0, %v1992_v3  ;;  %2162 = vmatpush3.bf16.msra.mxu0 %v2630_v49 }
 0x1f6   : > { %2166 = vmatpush3.bf16.msra.mxu1 %v2632_v50  ;;  %2039 = vmatprep.mubr.msk.f32.mxu0 %vm530_vm0, %v1824_v14 }
 0x1f7   : > { %2046 = vmatprep.mubr.msk.f32.mxu1 %vm530_vm0, %v1824_v14  ;;  %2168 = vmatprep.subr.bf16.mxu0 %v2167_v15 }
 0x1f8   : > { %2040 = vmatmul.mubr.msk.f32.vlgmr.msra.gmra.mrb[10].mxu0 %vm530_vm0, %v1825_v17  ;;  %2172 = vmatprep.subr.bf16.mxu1 %v2171_v16 }
 0x1f9   : > { %2047 = vmatmul.mubr.msk.f32.vlgmr.msra.gmra.mrb[10].mxu1 %vm530_vm0, %v1825_v17  ;;  %2170 = vmatpush3.bf16.msra.mxu0 %v2167_v15 }
 0x1fa   : > { %2174 = vmatpush3.bf16.msra.mxu1 %v2171_v16  ;;  %2176 = vmatprep.subr.bf16.mxu0 %v2175_v25 }
 0x1fb   : > { %2180 = vmatprep.subr.bf16.mxu1 %v2179_v30 }
 0x2cb   : > { %v2041_v18 = vpop.f32.mrb[10].mxu0 }
 0x2cc   : > { %v2048_v19 = vpop.f32.mrb[10].mxu1  ;;  %v1255_v20 = vpop.f32.mrb[11].mxu0 }
 0x2cd   : > { %v1330_v21 = vpop.f32.mrb[11].mxu1  ;;  %2053 = vmatprep.mubr.msk.f32.mxu0 %vm530_vm0, %v1255_v20 }
 0x2ce   : > { %2060 = vmatprep.mubr.msk.f32.mxu1 %vm530_vm0, %v1330_v21  ;;  %2054 = vmatmul.mubr.msk.f32.vlgmr.msra.gmra.mrb[8].mxu0 %vm530_vm0, %v2041_v18 }
 0x2cf   : > { %2061 = vmatmul.mubr.msk.f32.vlgmr.msra.gmra.mrb[8].mxu1 %vm530_vm0, %v2048_v19  ;;  %1609 = vmatprep.mubr.f32.mxu0 %v2313_v29 }
 0x2d0   : > { %1696 = vmatprep.mubr.f32.mxu1 %v2313_v29  ;;  %2178 = vmatpush1.bf16.msra.mxu0 %v2177_v31 }
 0x2d1   : > { %2182 = vmatpush1.bf16.msra.mxu1 %v2181_v34 }
 0x3a1   : > { %v2055_v35 = vpop.f32.mrb[8].mxu0 }
 0x3a2   : > { %v1839_v36 = vmul.f32 -1.442695, %v2055_v35  ;;  %v2062_v37 = vpop.f32.mrb[8].mxu1  ;;  %v1414_v38 = vpop.f32.mrb[9].mxu0 }
 0x3a3   : > { %v1841_v39 = vmul.f32 -1.442695, %v2062_v37  ;;  %v1838_v40 = vmul.f32 -1.442695, %v1414_v38  ;;  %v1500_v41 = vpop.f32.mrb[9].mxu1 }
 0x3a4   : > { %2233 = vpow2.f32 %v1839_v36  ;;  %v1840_v42 = vmul.f32 -1.442695, %v1500_v41 }
 0x3a5   : > { %2235 = vpow2.f32 %v1841_v39 }
 0x3a6   : > { %2237 = vpow2.f32 %v1838_v40 }
 0x3a7   : > { %2239 = vpow2.f32 %v1840_v42 }
 0x3ae   : > { %v2234_v43 = vpop.eup %2233 }
 0x3af   : > { %v2236_v44 = vpop.eup %2235  ;;  %v1518_v49 = vadd.f32 1.0, %v2234_v43 }
 0x3b0   : > { %v2238_v45 = vpop.eup %2237  ;;  %v1530_v50 = vadd.f32 1.0, %v2236_v44 }
 0x3b1   : > { %v2240_v46 = vpop.eup %2239  ;;  %v1517_v47 = vadd.f32 1.0, %v2238_v45 }
 0x3b2   : > { %v1529_v48 = vadd.f32 1.0, %v2240_v46 }
 0x3b3   : > { %2241 = vrcp.f32 %v1517_v47 }
 0x3b4   : > { %2243 = vrcp.f32 %v1529_v48 }
 0x3b5   : > { %2245 = vrcp.f32 %v1518_v49 }
 0x3b6   : > { %2247 = vrcp.f32 %v1530_v50 }
 0x3bd   : > { %v2242_v51 = vpop.eup %2241 }
 0x3be   : > { %v2244_v52 = vpop.eup %2243  ;;  %1842 = vmatmul.mubr.msk.f32.vlgmr.msra.gmra.mrb[12].mxu0 %vm530_vm0, %v2242_v51 }
 0x3bf   : > { %1844 = vmatmul.mubr.msk.f32.vlgmr.msra.gmra.mrb[12].mxu1 %vm530_vm0, %v2244_v52  ;;  %1615 = vmatprep.mubr.f32.mxu0 %v2313_v29  ;;  %v2246_v53 = vpop.eup %2245 }
 0x3c0   : > { %1702 = vmatprep.mubr.f32.mxu1 %v2313_v29  ;;  %v2248_v54 = vpop.eup %2247 }
 0x3c2   : > { %1843 = vmatmul.mubr.msk.f32.gmra.mrb[14].mxu0 %vm530_vm0, %v2246_v53 }
 0x3c3   : > { %1845 = vmatmul.mubr.msk.f32.gmra.mrb[14].mxu1 %vm530_vm0, %v2248_v54 }
 0x491   : > { %v1611_v55 = vpop.f32.mrb[12].mxu0 }
 0x492   : > { %v1698_v56 = vpop.f32.mrb[12].mxu1  ;;  %v1613_v57 = vpop.f32.mrb[13].mxu0 }
 0x493   : > { %v1709_v58 = vmul.f32 %v1698_v56, %v1611_v55  ;;  %v1700_v59 = vpop.f32.mrb[13].mxu1 }
 0x494   : > { %v1710_v60 = vmul.f32 %v1700_v59, %v1613_v57 }
 0x495   : > { %1713 = vst [vmem:[%s301_s24] sm:$0xff] %v1709_v58  ;;  %v1617_v61 = vpop.f32.mrb[14].mxu0 }
 0x496   : > { %1714 = vst [vmem:[%s301_s24 + $0x8] sm:$0xff] %v1710_v60  ;;  %v1704_v62 = vpop.f32.mrb[14].mxu1  ;;  %v1619_v63 = vpop.f32.mrb[15].mxu0 }
 0x497   : > { %v1711_v0 = vmul.f32 %v1704_v62, %v1617_v61  ;;  %v1706_v1 = vpop.f32.mrb[15].mxu1 }
 0x498   : > { %v1712_v2 = vmul.f32 %v1706_v1, %v1619_v63 }
 0x499   : > { %1715 = vst [vmem:[%s301_s24 + $0x10] sm:$0xff] %v1711_v0 }
 0x49a   : > { %1716 = vst [vmem:[%s301_s24 + $0x18] sm:$0xff] %v1712_v2 }
 0x49b   : > { %2262 = shalt.err (!%p2259_p3)
}
 0x49c   : > { %s2263_s17 = scalar_lea.hbm %s2754_s23, 512  ;;  %s2267_s24 = scalar_lea.hbm %s2805_s8, 1024 }
 0x49d   : > { %p2264_p4 = scmp.ne.s32.totalorder %s2754_s23, %s2263_s17  ;;  %p2268_p9 = scmp.lt.u32.totalorder %s2754_s23, %s2805_s8 }
 0x49e   : > { %p2269_p10 = scmp.lt.u32.totalorder %s2267_s24, %s2263_s17  ;;  %p2271_p12 = scmp.lt.u32.totalorder %s2263_s17, %s2754_s23 }
 0x49f   : > { %p2265_p7 = pnand %p2264_p4, %p2400_p5 }
 0x4a0   : > { %p2270_p11 = por %p2269_p10, %p2268_p9 }
 0x4a1   : > { %p2266_p8 = pneg %p2265_p7 }
 0x4a2   : > { %p2272_p13 = por %p2271_p12, %p2270_p11 }
 0x4a4   : > { %p2273_p0 = pnand %p2272_p13, %p2266_p8 }
 0x4a6   : > { %2276 = shalt.err (!%p2273_p0)
}
 0x4a7   : > { %s2315_s22 = smov 256   ;;  %s2316_s9 = smov 16  }
 0x4a8   : > { %2191 = dma.vmem_to_hbm [thread:$0]  (%p2400_p5), %s2749_s21, 512, %s2754_s23, %s2756_s12, %s2315_s22, %s2315_s22, %s2316_s9  }
 0x4a9 PF: > { %p2197_p1 = scmp.ge.s32.totalorder %s2311_s30, 2  ;;  %s1747_s25 = sand.u32 1, %s2299_s27  }
 0x4aa   : > { %s1748_s26 = scalar_lea.sflag [#allocation3], %s1747_s25 }
 0x4ab   : > { %p2194_p2 = pnand %p2197_p1, %p2404_p6 }
 0x4ad   : > { %2294 = dma.done.wait (!%p2194_p2), %s1748_s26, 512  }
 0x4ae   : > { %2296 = vsyncadd (!%p2194_p2), %s1748_s26, 4294966784  ;;  %p18_p3 = scmp.ge.s32.totalorder %s2387_s11, 4   ;;  %s2811_s27 = smov %s2303_s28 }
 0x4af   : > { %s2812_s28 = smov %s2307_s29  ;;  %s2813_s29 = smov %s2398_s14 }
 0x4b0   : > { %s2814_s30 = smov %s2387_s11  ;;  %20 = sbr.rel (!%p18_p3) target bundleno = 3 (0x3), region = 93 }
 0x4b7   :  { %1753 = vsyncpa [#allocation3], 1 }
 0x4b8   :  { %1755 = vsyncpa [#allocation3 + $0x1], 1 }

</bundles_post_ra>
